<compile_context>
chip_gen: v5e
topology: v5e:2x2
jax: 0.10.0
libtpu: 0.0.40
codegen_flags: <defaults>
</compile_context>

<pallas_src>
import functools

import jax
import jax.numpy as jnp
from jax.experimental import pallas as pl
from jax.experimental.pallas import tpu as pltpu


def _round_up(x, m):
    return (x + m - 1) // m * m


def _cdiv(a, b):
    return -(-a // b)


@functools.lru_cache(maxsize=1)
def _vmem_limit_bytes():
    # 48 MiB is safe on every generation (v7x has 64 MiB/TC); allow ~96 MiB
    # only when the hardware reports a 128-MiB-class VMEM (v5e/v6e).
    try:
        cap = int(pltpu.get_tpu_info().vmem_capacity_bytes)
    except Exception:  # pragma: no cover - defensive fallback
        cap = 64 * 1024 * 1024
    return max(48 * 1024 * 1024, min(int(cap * 0.75), 96 * 1024 * 1024))


# ----------------------------------------------------------------------------
# Phase 1: grouped conv matmul (MXU, K-tiled f32 accumulation) + per-tile
#          per-group-channel sum / sumsq.  Grid = (groups, M tiles, K tiles).
# ----------------------------------------------------------------------------
def _conv_stats_kernel(p_ref, w_ref, y_ref, s_ref, ss_ref, acc_ref):
    k = pl.program_id(2)

    @pl.when(k == 0)
    def _init():
        acc_ref[...] = jnp.zeros_like(acc_ref)

    acc_ref[...] += jnp.dot(p_ref[...], w_ref[...],
                            preferred_element_type=jnp.float32)

    @pl.when(k == pl.num_programs(2) - 1)
    def _finalize():
        y = acc_ref[...]                               # f32
        y_ref[...] = y.astype(y_ref.dtype)             # bf16 writeback (mem-bound)
        s = jnp.sum(y, axis=0, keepdims=True)          # (1, Cg_p) f32
        ss = jnp.sum(y * y, axis=0, keepdims=True)     # (1, Cg_p) f32
        # Broadcast to 8 sublanes so the per-tile stats block is (8, Cg_p)-tileable.
        s_ref[...] = jnp.broadcast_to(s, s_ref.shape)
        ss_ref[...] = jnp.broadcast_to(ss, ss_ref.shape)


# ----------------------------------------------------------------------------
# Phase 2: normalize + affine + ReLU (pure VPU, per M tile, f32 math).
# ----------------------------------------------------------------------------
def _bn_act_kernel(y_ref, scale_ref, shift_ref, o_ref, *, use_relu):
    y = y_ref[...].astype(jnp.float32)
    out = y * scale_ref[...] + shift_ref[...]
    if use_relu:
        out = jnp.maximum(out, 0.0)
    o_ref[...] = out.astype(o_ref.dtype)


# ----------------------------------------------------------------------------
# Host-side glue
# ----------------------------------------------------------------------------
def _im2col(x, kh, kw, stride, padding):
    """x: (N, Cin, H, W) -> patches (N*OH*OW, Cin*kh*kw). K order: (cin, kh, kw)."""
    n, c, h, w = x.shape
    xp = jnp.pad(x, ((0, 0), (0, 0), (padding, padding), (padding, padding)))
    oh = (h + 2 * padding - kh) // stride + 1
    ow = (w + 2 * padding - kw) // stride + 1
    cols = []
    for i in range(kh):
        for j in range(kw):
            cols.append(xp[:, :, i:i + stride * oh:stride, j:j + stride * ow:stride])
    p = jnp.stack(cols, axis=2)                      # (N, Cin, kh*kw, OH, OW)
    p = p.transpose(0, 3, 4, 1, 2).reshape(n * oh * ow, c * kh * kw)
    return p, oh, ow


def basic_conv(x, weight, bias, gamma, beta, *, stride=1, padding=0,
               use_relu=True, groups=1, eps=1e-5, tile_m=512,
               compute_dtype=jnp.bfloat16):
    """Forward of BasicConv. x: (N, Cin, H, W) f32; weight: (Cout, Cin//groups, KH, KW)."""
    n, cin, _, _ = x.shape
    cout, cin_g, kh, kw = weight.shape
    assert cin_g * groups == cin and cout % groups == 0
    del bias  # absorbed exactly by BN's batch-mean subtraction (mathematical no-op)

    cout_g = cout // groups
    kg = cin_g * kh * kw

    # im2col directly in bf16 (halves the KH*KW-inflated patch intermediate).
    patches, oh, ow = _im2col(x.astype(compute_dtype), kh, kw, stride, padding)
    m = patches.shape[0]

    # Alignment: 256-multiples fill the 256x256 MXU (v6e/v7x) when the true dim
    # is large enough; 128 otherwise (also fine on v5e's 128x128 MXU).
    c_align = 256 if cout_g >= 256 else 128
    k_align = 256 if kg >= 256 else 128
    coutg_p = _round_up(cout_g, c_align)

    # K tiling: cap each K tile so the (tk, coutg_p) bf16 weight block stays
    # small enough for v7x's 64 MiB VMEM even with double buffering.
    max_tk = 1024
    kg_al = _round_up(kg, k_align)
    n_k = max(1, _cdiv(kg_al, max_tk))
    tk = _round_up(_cdiv(kg_al, n_k), k_align)
    kg_p = n_k * tk

    tile_m = _round_up(max(8, min(tile_m, _round_up(m, 8))), 8)
    m_p = _round_up(m, tile_m)
    n_m = m_p // tile_m
    c_total = groups * coutg_p

    # Group-padded, K-tiled patch layout: (m_p, groups * kg_p).
    p3 = patches.reshape(m, groups, kg)
    p3 = jnp.pad(p3, ((0, m_p - m), (0, 0), (0, kg_p - kg)))
    patches_p = p3.reshape(m_p, groups * kg_p)

    # Per-group (kg_p, coutg_p) weight blocks stacked along K: (groups*kg_p, coutg_p).
    w3 = jnp.transpose(weight.reshape(groups, cout_g, kg), (0, 2, 1))
    w3 = jnp.pad(w3, ((0, 0), (0, kg_p - kg), (0, coutg_p - cout_g)))
    w_p = w3.astype(compute_dtype).reshape(groups * kg_p, coutg_p)

    vmem_limit = _vmem_limit_bytes()
    cparams1 = pltpu.CompilerParams(
        dimension_semantics=("parallel", "parallel", "arbitrary"),
        vmem_limit_bytes=vmem_limit)

    # --- Phase 1: K-tiled grouped matmul + per-tile channel statistics ---
    y, psum, psumsq = pl.pallas_call(
        _conv_stats_kernel,
        out_shape=(
            jax.ShapeDtypeStruct((m_p, c_total), compute_dtype),      # bf16 y
            jax.ShapeDtypeStruct((n_m * 8, c_total), jnp.float32),    # partial sums
            jax.ShapeDtypeStruct((n_m * 8, c_total), jnp.float32),    # partial sumsq
        ),
        grid=(groups, n_m, n_k),
        in_specs=[
            pl.BlockSpec((tile_m, tk), lambda g, i, k: (i, g * n_k + k)),
            pl.BlockSpec((tk, coutg_p), lambda g, i, k: (g * n_k + k, 0)),
        ],
        out_specs=(
            pl.BlockSpec((tile_m, coutg_p), lambda g, i, k: (i, g)),
            pl.BlockSpec((8, coutg_p), lambda g, i, k: (i, g)),
            pl.BlockSpec((8, coutg_p), lambda g, i, k: (i, g)),
        ),
        scratch_shapes=[pltpu.VMEM((tile_m, coutg_p), jnp.float32)],
        compiler_params=cparams1,
    )(patches_p, w_p)

    # Tiny host-side reduction over per-tile partials (n_m x C_total).
    tot = psum.reshape(n_m, 8, c_total)[:, 0, :].sum(axis=0)
    tot_sq = psumsq.reshape(n_m, 8, c_total)[:, 0, :].sum(axis=0)
    inv_m = 1.0 / float(m)     # padded M/K rows are all-zero (no conv bias) -> contribute 0
    mean = tot * inv_m
    # TODO(synk): switch to per-tile mean-shifted sums (Welford merge) if |mean|>>std
    #             at very large M; the clamp below only guards against tiny negatives.
    var = jnp.maximum(tot_sq * inv_m - mean * mean, 0.0)

    gamma_p = jnp.pad(gamma.reshape(groups, cout_g).astype(jnp.float32),
                      ((0, 0), (0, coutg_p - cout_g))).reshape(-1)
    beta_p = jnp.pad(beta.reshape(groups, cout_g).astype(jnp.float32),
                     ((0, 0), (0, coutg_p - cout_g))).reshape(-1)
    scale = gamma_p * jax.lax.rsqrt(var + eps)
    shift = beta_p - mean * scale

    # --- Phase 2: normalize + affine + ReLU (mem-bound; reads bf16 y) ---
    out2d = pl.pallas_call(
        functools.partial(_bn_act_kernel, use_relu=use_relu),
        out_shape=jax.ShapeDtypeStruct((m_p, c_total), jnp.float32),
        grid=(n_m,),
        in_specs=[
            pl.BlockSpec((tile_m, c_total), lambda i: (i, 0)),
            pl.BlockSpec((1, c_total), lambda i: (0, 0)),
            pl.BlockSpec((1, c_total), lambda i: (0, 0)),
        ],
        out_specs=pl.BlockSpec((tile_m, c_total), lambda i: (i, 0)),
        compiler_params=pltpu.CompilerParams(
            dimension_semantics=("parallel",),
            vmem_limit_bytes=vmem_limit),
    )(y, scale.reshape(1, c_total), shift.reshape(1, c_total))

    # (M, groups*Cg_p) -> (M, Cout) -> (N, OH, OW, Cout) -> NCHW
    out = out2d[:m].reshape(m, groups, coutg_p)[:, :, :cout_g].reshape(m, cout)
    return out.reshape(n, oh, ow, cout).transpose(0, 3, 1, 2)


# ----------------------------------------------------------------------------
# Reference (uses bf16-cast inputs like the kernel; includes the conv bias to
# demonstrate that BN absorbs it exactly).
# ----------------------------------------------------------------------------
def _reference(x, weight, bias, gamma, beta, *, stride, padding, use_relu,
               groups, eps, compute_dtype=jnp.bfloat16):
    y = jax.lax.conv_general_dilated(
        x.astype(compute_dtype), weight.astype(compute_dtype),
        window_strides=(stride, stride),
        padding=[(padding, padding), (padding, padding)],
        dimension_numbers=("NCHW", "OIHW", "NCHW"),
        feature_group_count=groups,
        preferred_element_type=jnp.float32)
    y = y + bias[None, :, None, None]
    mean = y.mean(axis=(0, 2, 3), keepdims=True)
    var = ((y - mean) ** 2).mean(axis=(0, 2, 3), keepdims=True)
    y = (y - mean) * jax.lax.rsqrt(var + eps)
    y = y * gamma[None, :, None, None] + beta[None, :, None, None]
    if use_relu:
        y = jnp.maximum(y, 0.0)
    return y


if __name__ == "__main__":
    N, H, W = 2, 16, 16
    configs = [
        # Bottleneck conv2: 3x3, stride 1, pad 1, ReLU
        dict(cin=4, cout=8, k=3, stride=1, padding=1, use_relu=True, groups=1),
        # Downsample / 1x1 projection, no ReLU
        dict(cin=4, cout=16, k=1, stride=1, padding=0, use_relu=False, groups=1),
        # Grouped 3x3 (ResNeXt-style cardinality)
        dict(cin=8, cout=8, k=3, stride=1, padding=1, use_relu=True, groups=2),
    ]

    basic_conv_jit = jax.jit(
        basic_conv,
        static_argnames=("stride", "padding", "use_relu", "groups", "eps",
                         "tile_m", "compute_dtype"))

    key = jax.random.PRNGKey(0)
    for cfg in configs:
        key, kx, kw_, kb, kg_, kbeta = jax.random.split(key, 6)
        cin, cout, ks, groups = cfg["cin"], cfg["cout"], cfg["k"], cfg["groups"]
        x = jax.random.normal(kx, (N, cin, H, W), dtype=jnp.float32)
        weight = jax.random.normal(
            kw_, (cout, cin // groups, ks, ks), dtype=jnp.float32) * 0.1
        bias = jax.random.normal(kb, (cout,), dtype=jnp.float32) * 0.1
        gamma = 1.0 + 0.1 * jax.random.normal(kg_, (cout,), dtype=jnp.float32)
        beta = 0.1 * jax.random.normal(kbeta, (cout,), dtype=jnp.float32)

        out = basic_conv_jit(x, weight, bias, gamma, beta,
                             stride=cfg["stride"], padding=cfg["padding"],
                             use_relu=cfg["use_relu"], groups=groups)
        out = jax.block_until_ready(out)

        ref = _reference(x, weight, bias, gamma, beta,
                         stride=cfg["stride"], padding=cfg["padding"],
                         use_relu=cfg["use_relu"], groups=groups, eps=1e-5)
        assert out.shape == ref.shape, f"shape mismatch {out.shape} vs {ref.shape}"
        # bf16 MXU inputs + bf16 y intermediate -> compare with bf16-appropriate tolerance.
        assert jnp.allclose(out, ref, atol=3e-2, rtol=3e-2), \
            f"mismatch vs reference for config {cfg}"

    print("KERNEL_OK")
</pallas_src>

<mosaic_0001>
module attributes {stable_mosaic.version = 11 : i64} {
  func.func @_conv_stats_kernel(%arg0: i32, %arg1: i32, %arg2: i32, %arg3: memref<512x128xbf16, #tpu.memory_space<vmem>>, %arg4: memref<128x128xbf16, #tpu.memory_space<vmem>>, %arg5: memref<512x128xbf16, #tpu.memory_space<vmem>>, %arg6: memref<8x128xf32, #tpu.memory_space<vmem>>, %arg7: memref<8x128xf32, #tpu.memory_space<vmem>>, %arg8: memref<512x128xf32, #tpu.memory_space<vmem>>) attributes {dimension_semantics = [#tpu.dimension_semantics<parallel>, #tpu.dimension_semantics<parallel>, #tpu.dimension_semantics<arbitrary>], iteration_bounds = array<i64: 1, 1, 1>, scalar_prefetch = 0 : i64, scratch_operands = 1 : i64, tpu.core_type = #tpu.core_type<tc>, window_params = [{transform_indices = @transform_0, window_bounds = array<i64: 512, 128>}, {transform_indices = @transform_1, window_bounds = array<i64: 128, 128>}, {transform_indices = @transform_2, window_bounds = array<i64: 512, 128>}, {transform_indices = @transform_3, window_bounds = array<i64: 8, 128>}, {transform_indices = @transform_4, window_bounds = array<i64: 8, 128>}]} {
    %c0_i32 = arith.constant 0 : i32
    %0 = arith.cmpi eq, %arg2, %c0_i32 : i32
    %1 = arith.extui %0 : i1 to i32
    %c0_i32_0 = arith.constant 0 : i32
    %2 = arith.cmpi ne, %1, %c0_i32_0 : i32
    scf.if %2 {
      %cst_10 = arith.constant 0.000000e+00 : f32
      %12 = vector.broadcast %cst_10 : f32 to vector<512x128xf32>
      %c0_11 = arith.constant 0 : index
      %c0_12 = arith.constant 0 : index
      %13 = vector.load %arg8[%c0_11, %c0_12] : memref<512x128xf32, #tpu.memory_space<vmem>>, vector<512x128xf32>
      tpu.vector_store %arg8[%c0_11, %c0_12], %12 {strides = array<i32>} : memref<512x128xf32, #tpu.memory_space<vmem>>, vector<512x128xf32>,
    } else {
    }
    %c0 = arith.constant 0 : index
    %c0_1 = arith.constant 0 : index
    %3 = vector.load %arg8[%c0, %c0_1] : memref<512x128xf32, #tpu.memory_space<vmem>>, vector<512x128xf32>
    %c0_2 = arith.constant 0 : index
    %c0_3 = arith.constant 0 : index
    %4 = vector.load %arg3[%c0_2, %c0_3] : memref<512x128xbf16, #tpu.memory_space<vmem>>, vector<512x128xbf16>
    %c0_4 = arith.constant 0 : index
    %c0_5 = arith.constant 0 : index
    %5 = vector.load %arg4[%c0_4, %c0_5] : memref<128x128xbf16, #tpu.memory_space<vmem>>, vector<128x128xbf16>
    %cst = arith.constant dense<0.000000e+00> : vector<512x128xf32>
    %6 = tpu.matmul %4, %5, %cst {dimension_numbers = #tpu.dot_dimension_numbers<[1], [0], [0], [1], [0, 0, 1, 1], [], []>} : vector<512x128xbf16>, vector<128x128xbf16>, vector<512x128xf32> -> vector<512x128xf32>
    %7 = arith.addf %3, %6 : vector<512x128xf32>
    %c0_6 = arith.constant 0 : index
    %c0_7 = arith.constant 0 : index
    %8 = vector.load %arg8[%c0_6, %c0_7] : memref<512x128xf32, #tpu.memory_space<vmem>>, vector<512x128xf32>
    tpu.vector_store %arg8[%c0_6, %c0_7], %7 {strides = array<i32>} : memref<512x128xf32, #tpu.memory_space<vmem>>, vector<512x128xf32>,
    %c0_i32_8 = arith.constant 0 : i32
    %9 = arith.cmpi eq, %arg2, %c0_i32_8 : i32
    %10 = arith.extui %9 : i1 to i32
    %c0_i32_9 = arith.constant 0 : i32
    %11 = arith.cmpi ne, %10, %c0_i32_9 : i32
    scf.if %11 {
      %c0_10 = arith.constant 0 : index
      %c0_11 = arith.constant 0 : index
      %12 = vector.load %arg8[%c0_10, %c0_11] : memref<512x128xf32, #tpu.memory_space<vmem>>, vector<512x128xf32>
      %13 = arith.truncf %12 : vector<512x128xf32> to vector<512x128xbf16>
      %c0_12 = arith.constant 0 : index
      %c0_13 = arith.constant 0 : index
      %14 = vector.load %arg5[%c0_12, %c0_13] : memref<512x128xbf16, #tpu.memory_space<vmem>>, vector<512x128xbf16>
      tpu.vector_store %arg5[%c0_12, %c0_13], %13 {strides = array<i32>} : memref<512x128xbf16, #tpu.memory_space<vmem>>, vector<512x128xbf16>,
      %cst_14 = arith.constant dense<0.000000e+00> : vector<128xf32>
      %15 = vector.multi_reduction <add>, %12, %cst_14 [0] : vector<512x128xf32> to vector<128xf32>
      %16 = vector.shape_cast %15 : vector<128xf32> to vector<1x128xf32>
      %17 = arith.mulf %12, %12 : vector<512x128xf32>
      %cst_15 = arith.constant dense<0.000000e+00> : vector<128xf32>
      %18 = vector.multi_reduction <add>, %17, %cst_15 [0] : vector<512x128xf32> to vector<128xf32>
      %19 = vector.shape_cast %18 : vector<128xf32> to vector<1x128xf32>
      %20 = vector.shape_cast %16 : vector<1x128xf32> to vector<1x128xf32>
      %21 = vector.broadcast %20 : vector<1x128xf32> to vector<8x128xf32>
      %c0_16 = arith.constant 0 : index
      %c0_17 = arith.constant 0 : index
      %22 = vector.load %arg6[%c0_16, %c0_17] : memref<8x128xf32, #tpu.memory_space<vmem>>, vector<8x128xf32>
      tpu.vector_store %arg6[%c0_16, %c0_17], %21 {strides = array<i32>} : memref<8x128xf32, #tpu.memory_space<vmem>>, vector<8x128xf32>,
      %23 = vector.shape_cast %19 : vector<1x128xf32> to vector<1x128xf32>
      %24 = vector.broadcast %23 : vector<1x128xf32> to vector<8x128xf32>
      %c0_18 = arith.constant 0 : index
      %c0_19 = arith.constant 0 : index
      %25 = vector.load %arg7[%c0_18, %c0_19] : memref<8x128xf32, #tpu.memory_space<vmem>>, vector<8x128xf32>
      tpu.vector_store %arg7[%c0_18, %c0_19], %24 {strides = array<i32>} : memref<8x128xf32, #tpu.memory_space<vmem>>, vector<8x128xf32>,
    } else {
    }
    return
  }
  func.func @transform_0(%arg0: i32, %arg1: i32, %arg2: i32) -> (i32, i32) {
    %c1_i32 = arith.constant 1 : i32
    %0 = arith.muli %arg0, %c1_i32 : i32
    %1 = arith.addi %0, %arg2 : i32
    %c0_i32 = arith.constant 0 : i32
    return %arg1, %1 : i32, i32
  }
  func.func @transform_1(%arg0: i32, %arg1: i32, %arg2: i32) -> (i32, i32) {
    %c1_i32 = arith.constant 1 : i32
    %0 = arith.muli %arg0, %c1_i32 : i32
    %1 = arith.addi %0, %arg2 : i32
    %c0_i32 = arith.constant 0 : i32
    %c0_i32_0 = arith.constant 0 : i32
    return %1, %c0_i32 : i32, i32
  }
  func.func @transform_2(%arg0: i32, %arg1: i32, %arg2: i32) -> (i32, i32) {
    %c0_i32 = arith.constant 0 : i32
    return %arg1, %arg0 : i32, i32
  }
  func.func @transform_3(%arg0: i32, %arg1: i32, %arg2: i32) -> (i32, i32) {
    %c0_i32 = arith.constant 0 : i32
    return %arg1, %arg0 : i32, i32
  }
  func.func @transform_4(%arg0: i32, %arg1: i32, %arg2: i32) -> (i32, i32) {
    %c0_i32 = arith.constant 0 : i32
    return %arg1, %arg0 : i32, i32
  }
}

module attributes {stable_mosaic.version = 11 : i64} {
  func.func @_bn_act_kernel(%arg0: i32, %arg1: memref<512x128xbf16, #tpu.memory_space<vmem>>, %arg2: memref<1x128xf32, #tpu.memory_space<vmem>>, %arg3: memref<1x128xf32, #tpu.memory_space<vmem>>, %arg4: memref<512x128xf32, #tpu.memory_space<vmem>>) attributes {dimension_semantics = [#tpu.dimension_semantics<parallel>], iteration_bounds = array<i64: 1>, scalar_prefetch = 0 : i64, scratch_operands = 0 : i64, tpu.core_type = #tpu.core_type<tc>, window_params = [{transform_indices = @transform_0, window_bounds = array<i64: 512, 128>}, {pipeline_mode = #tpu.pipeline_mode<synchronous>, transform_indices = @transform_1, window_bounds = array<i64: 1, 128>}, {pipeline_mode = #tpu.pipeline_mode<synchronous>, transform_indices = @transform_2, window_bounds = array<i64: 1, 128>}, {transform_indices = @transform_3, window_bounds = array<i64: 512, 128>}]} {
    %c0 = arith.constant 0 : index
    %c0_0 = arith.constant 0 : index
    %0 = vector.load %arg1[%c0, %c0_0] : memref<512x128xbf16, #tpu.memory_space<vmem>>, vector<512x128xbf16>
    %1 = arith.extf %0 : vector<512x128xbf16> to vector<512x128xf32>
    %c0_1 = arith.constant 0 : index
    %c0_2 = arith.constant 0 : index
    %2 = vector.load %arg2[%c0_1, %c0_2] : memref<1x128xf32, #tpu.memory_space<vmem>>, vector<1x128xf32>
    %3 = vector.broadcast %2 : vector<1x128xf32> to vector<512x128xf32>
    %4 = arith.mulf %1, %3 : vector<512x128xf32>
    %c0_3 = arith.constant 0 : index
    %c0_4 = arith.constant 0 : index
    %5 = vector.load %arg3[%c0_3, %c0_4] : memref<1x128xf32, #tpu.memory_space<vmem>>, vector<1x128xf32>
    %6 = vector.broadcast %5 : vector<1x128xf32> to vector<512x128xf32>
    %7 = arith.addf %4, %6 : vector<512x128xf32>
    %cst = arith.constant 0.000000e+00 : f32
    %8 = vector.broadcast %cst : f32 to vector<512x128xf32>
    %9 = arith.maximumf %7, %8 : vector<512x128xf32>
    %c0_5 = arith.constant 0 : index
    %c0_6 = arith.constant 0 : index
    %10 = vector.load %arg4[%c0_5, %c0_6] : memref<512x128xf32, #tpu.memory_space<vmem>>, vector<512x128xf32>
    tpu.vector_store %arg4[%c0_5, %c0_6], %9 {strides = array<i32>} : memref<512x128xf32, #tpu.memory_space<vmem>>, vector<512x128xf32>,
    return
  }
  func.func @transform_0(%arg0: i32) -> (i32, i32) {
    %c0_i32 = arith.constant 0 : i32
    %c0_i32_0 = arith.constant 0 : i32
    return %arg0, %c0_i32 : i32, i32
  }
  func.func @transform_1(%arg0: i32) -> (i32, i32) {
    %c0_i32 = arith.constant 0 : i32
    %c0_i32_0 = arith.constant 0 : i32
    %c0_i32_1 = arith.constant 0 : i32
    return %c0_i32, %c0_i32_0 : i32, i32
  }
  func.func @transform_2(%arg0: i32) -> (i32, i32) {
    %c0_i32 = arith.constant 0 : i32
    %c0_i32_0 = arith.constant 0 : i32
    %c0_i32_1 = arith.constant 0 : i32
    return %c0_i32, %c0_i32_0 : i32, i32
  }
  func.func @transform_3(%arg0: i32) -> (i32, i32) {
    %c0_i32 = arith.constant 0 : i32
    %c0_i32_0 = arith.constant 0 : i32
    return %arg0, %c0_i32 : i32, i32
  }
}

</mosaic_0001>

<bundles_post_ra>
// kernel: basic_conv.3
= control target key start
LH: loop header
LB: loop body
LE: loop exit
PB: predicated region body
PF: predicated region fallthrough
CT: control target
= control target key end

     0   :  { %s1017_s0 = inlined_call_operand.vmem [shape: bf16[512,128], index: 0, kind: input, shape index: {}]   ;;  %s1018_s1 = inlined_call_operand.vmem [shape: f32[1,128], index: 1, kind: input, shape index: {}]   ;;  %s1019_s2 = inlined_call_operand.vmem [shape: f32[1,128], index: 2, kind: input, shape index: {}]   ;;  %s1020_s3 = inlined_call_operand.vmem [shape: f32[512,128], index: 3, kind: output, shape index: {}]  }
   0x1   :  { %v411_v0 = vld [vmem:[%s1017_s0] sm:$0xff]   ;;  %v538_v5 = vld [vmem:[%s1017_s0 + $0x8] sm:$0xff]   ;;  %v539_v8 = vld [vmem:[%s1017_s0 + $0x10] sm:$0xff]  }
   0x2   :  { %v597_v1 = vld [vmem:[%s1018_s1] ss:$0 sm:$0xff]  ;;  %v412_v2 = vunpack.c.l.bf16 %v411_v0  ;;  %v413_v4 = vunpack.c.h.bf16 %v411_v0  ;;  %v416_v6 = vunpack.c.l.bf16 %v538_v5  ;;  %v417_v7 = vunpack.c.h.bf16 %v538_v5  ;;  %v540_v9 = vld [vmem:[%s1017_s0 + $0x18] sm:$0xff]   ;;  %v542_v31 = vld [vmem:[%s1017_s0 + $0x28] sm:$0xff]  }
   0x3   :  { %v602_v3 = vld [vmem:[%s1019_s2] ss:$0 sm:$0xff]  ;;  %v420_v12 = vunpack.c.l.bf16 %v539_v8  ;;  %v421_v13 = vunpack.c.h.bf16 %v539_v8  ;;  %v424_v16 = vunpack.c.l.bf16 %v540_v9  ;;  %v425_v17 = vunpack.c.h.bf16 %v540_v9  ;;  %v543_v36 = vld [vmem:[%s1017_s0 + $0x30] sm:$0xff]   ;;  %v544_v41 = vld [vmem:[%s1017_s0 + $0x38] sm:$0xff]  }
   0x4   :  { %v146_v10 = vmul.f32 %v597_v1, %v412_v2  ;;  %v147_v11 = vmul.f32 %v597_v1, %v413_v4  ;;  %v148_v14 = vmul.f32 %v597_v1, %v416_v6  ;;  %v149_v15 = vmul.f32 %v597_v1, %v417_v7  ;;  %v541_v26 = vld [vmem:[%s1017_s0 + $0x20] sm:$0xff]   ;;  %v546_v5 = vld [vmem:[%s1017_s0 + $0x48] sm:$0xff]  }
   0x5   :  { %v150_v20 = vmul.f32 %v597_v1, %v420_v12  ;;  %v151_v21 = vmul.f32 %v597_v1, %v421_v13  ;;  %v152_v24 = vmul.f32 %v597_v1, %v424_v16  ;;  %v153_v25 = vmul.f32 %v597_v1, %v425_v17  ;;  %v545_v62 = vld [vmem:[%s1017_s0 + $0x40] sm:$0xff]  }
   0x6   :  { %v214_v18 = vadd.f32 %v602_v3, %v146_v10  ;;  %v215_v19 = vadd.f32 %v602_v3, %v147_v11  ;;  %v216_v22 = vadd.f32 %v602_v3, %v148_v14  ;;  %v217_v23 = vadd.f32 %v602_v3, %v149_v15  ;;  %v547_v10 = vld [vmem:[%s1017_s0 + $0x50] sm:$0xff]   ;;  %v548_v15 = vld [vmem:[%s1017_s0 + $0x58] sm:$0xff]  }
   0x7   :  { %v218_v29 = vadd.f32 %v602_v3, %v150_v20  ;;  %v219_v30 = vadd.f32 %v602_v3, %v151_v21  ;;  %v220_v34 = vadd.f32 %v602_v3, %v152_v24  ;;  %v221_v35 = vadd.f32 %v602_v3, %v153_v25 }
   0x8   :  { %v278_v27 = vmax.f32 %v214_v18, 0.0  ;;  %v279_v28 = vmax.f32 %v215_v19, 0.0  ;;  %v280_v32 = vmax.f32 %v216_v22, 0.0  ;;  %v281_v33 = vmax.f32 %v217_v23, 0.0 }
   0x9   :  { %v282_v37 = vmax.f32 %v218_v29, 0.0  ;;  %v283_v38 = vmax.f32 %v219_v30, 0.0  ;;  %v428_v39 = vunpack.c.l.bf16 %v541_v26  ;;  %v429_v40 = vunpack.c.h.bf16 %v541_v26 }
   0xa   :  { %342 = vst [vmem:[%s1020_s3] sm:$0xff] %v278_v27  ;;  %v284_v42 = vmax.f32 %v220_v34, 0.0  ;;  %v285_v43 = vmax.f32 %v221_v35, 0.0  ;;  %v432_v44 = vunpack.c.l.bf16 %v542_v31  ;;  %v433_v45 = vunpack.c.h.bf16 %v542_v31 }
   0xb   :  { %343 = vst [vmem:[%s1020_s3 + $0x8] sm:$0xff] %v279_v28  ;;  %v154_v46 = vmul.f32 %v597_v1, %v428_v39  ;;  %v155_v47 = vmul.f32 %v597_v1, %v429_v40  ;;  %v436_v48 = vunpack.c.l.bf16 %v543_v36  ;;  %v437_v49 = vunpack.c.h.bf16 %v543_v36  ;;  %v549_v36 = vld [vmem:[%s1017_s0 + $0x60] sm:$0xff]  }
   0xc   :  { %344 = vst [vmem:[%s1020_s3 + $0x10] sm:$0xff] %v280_v32  ;;  %v156_v50 = vmul.f32 %v597_v1, %v432_v44  ;;  %v157_v51 = vmul.f32 %v597_v1, %v433_v45  ;;  %v440_v52 = vunpack.c.l.bf16 %v544_v41  ;;  %v441_v53 = vunpack.c.h.bf16 %v544_v41  ;;  %v550_v41 = vld [vmem:[%s1017_s0 + $0x68] sm:$0xff]  }
   0xd   :  { %345 = vst [vmem:[%s1020_s3 + $0x18] sm:$0xff] %v281_v33  ;;  %v222_v54 = vadd.f32 %v602_v3, %v154_v46  ;;  %v223_v55 = vadd.f32 %v602_v3, %v155_v47  ;;  %v158_v56 = vmul.f32 %v597_v1, %v436_v48  ;;  %v159_v57 = vmul.f32 %v597_v1, %v437_v49  ;;  %v551_v46 = vld [vmem:[%s1017_s0 + $0x70] sm:$0xff]  }
   0xe   :  { %346 = vst [vmem:[%s1020_s3 + $0x20] sm:$0xff] %v282_v37  ;;  %v224_v58 = vadd.f32 %v602_v3, %v156_v50  ;;  %v225_v59 = vadd.f32 %v602_v3, %v157_v51  ;;  %v160_v60 = vmul.f32 %v597_v1, %v440_v52  ;;  %v161_v61 = vmul.f32 %v597_v1, %v441_v53  ;;  %v552_v51 = vld [vmem:[%s1017_s0 + $0x78] sm:$0xff]  }
   0xf   :  { %347 = vst [vmem:[%s1020_s3 + $0x28] sm:$0xff] %v283_v38  ;;  %v286_v63 = vmax.f32 %v222_v54, 0.0  ;;  %v287_v0 = vmax.f32 %v223_v55, 0.0  ;;  %v226_v2 = vadd.f32 %v602_v3, %v158_v56  ;;  %v227_v4 = vadd.f32 %v602_v3, %v159_v57 }
  0x10   :  { %348 = vst [vmem:[%s1020_s3 + $0x30] sm:$0xff] %v284_v42  ;;  %v288_v6 = vmax.f32 %v224_v58, 0.0  ;;  %v289_v7 = vmax.f32 %v225_v59, 0.0  ;;  %v228_v8 = vadd.f32 %v602_v3, %v160_v60  ;;  %v229_v9 = vadd.f32 %v602_v3, %v161_v61 }
  0x11   :  { %349 = vst [vmem:[%s1020_s3 + $0x38] sm:$0xff] %v285_v43  ;;  %v290_v11 = vmax.f32 %v226_v2, 0.0  ;;  %v291_v12 = vmax.f32 %v227_v4, 0.0  ;;  %v444_v13 = vunpack.c.l.bf16 %v545_v62  ;;  %v445_v14 = vunpack.c.h.bf16 %v545_v62 }
  0x12   :  { %350 = vst [vmem:[%s1020_s3 + $0x40] sm:$0xff] %v286_v63  ;;  %v292_v16 = vmax.f32 %v228_v8, 0.0  ;;  %v293_v17 = vmax.f32 %v229_v9, 0.0  ;;  %v448_v18 = vunpack.c.l.bf16 %v546_v5  ;;  %v449_v19 = vunpack.c.h.bf16 %v546_v5 }
  0x13   :  { %351 = vst [vmem:[%s1020_s3 + $0x48] sm:$0xff] %v287_v0  ;;  %v162_v20 = vmul.f32 %v597_v1, %v444_v13  ;;  %v163_v21 = vmul.f32 %v597_v1, %v445_v14  ;;  %v452_v22 = vunpack.c.l.bf16 %v547_v10  ;;  %v453_v23 = vunpack.c.h.bf16 %v547_v10  ;;  %v553_v10 = vld [vmem:[%s1017_s0 + $0x80] sm:$0xff]  }
  0x14   :  { %352 = vst [vmem:[%s1020_s3 + $0x50] sm:$0xff] %v288_v6  ;;  %v164_v24 = vmul.f32 %v597_v1, %v448_v18  ;;  %v165_v25 = vmul.f32 %v597_v1, %v449_v19  ;;  %v456_v26 = vunpack.c.l.bf16 %v548_v15  ;;  %v457_v27 = vunpack.c.h.bf16 %v548_v15  ;;  %v554_v15 = vld [vmem:[%s1017_s0 + $0x88] sm:$0xff]  }
  0x15   :  { %353 = vst [vmem:[%s1020_s3 + $0x58] sm:$0xff] %v289_v7  ;;  %v230_v28 = vadd.f32 %v602_v3, %v162_v20  ;;  %v231_v29 = vadd.f32 %v602_v3, %v163_v21  ;;  %v166_v30 = vmul.f32 %v597_v1, %v452_v22  ;;  %v167_v31 = vmul.f32 %v597_v1, %v453_v23  ;;  %v555_v20 = vld [vmem:[%s1017_s0 + $0x90] sm:$0xff]  }
  0x16   :  { %354 = vst [vmem:[%s1020_s3 + $0x60] sm:$0xff] %v290_v11  ;;  %v232_v32 = vadd.f32 %v602_v3, %v164_v24  ;;  %v233_v33 = vadd.f32 %v602_v3, %v165_v25  ;;  %v168_v34 = vmul.f32 %v597_v1, %v456_v26  ;;  %v169_v35 = vmul.f32 %v597_v1, %v457_v27  ;;  %v556_v25 = vld [vmem:[%s1017_s0 + $0x98] sm:$0xff]  }
  0x17   :  { %355 = vst [vmem:[%s1020_s3 + $0x68] sm:$0xff] %v291_v12  ;;  %v294_v37 = vmax.f32 %v230_v28, 0.0  ;;  %v295_v38 = vmax.f32 %v231_v29, 0.0  ;;  %v234_v39 = vadd.f32 %v602_v3, %v166_v30  ;;  %v235_v40 = vadd.f32 %v602_v3, %v167_v31 }
  0x18   :  { %356 = vst [vmem:[%s1020_s3 + $0x70] sm:$0xff] %v292_v16  ;;  %v296_v42 = vmax.f32 %v232_v32, 0.0  ;;  %v297_v43 = vmax.f32 %v233_v33, 0.0  ;;  %v236_v44 = vadd.f32 %v602_v3, %v168_v34  ;;  %v237_v45 = vadd.f32 %v602_v3, %v169_v35 }
  0x19   :  { %357 = vst [vmem:[%s1020_s3 + $0x78] sm:$0xff] %v293_v17  ;;  %v298_v47 = vmax.f32 %v234_v39, 0.0  ;;  %v299_v48 = vmax.f32 %v235_v40, 0.0  ;;  %v460_v49 = vunpack.c.l.bf16 %v549_v36  ;;  %v461_v50 = vunpack.c.h.bf16 %v549_v36 }
  0x1a   :  { %358 = vst [vmem:[%s1020_s3 + $0x80] sm:$0xff] %v294_v37  ;;  %v300_v52 = vmax.f32 %v236_v44, 0.0  ;;  %v301_v53 = vmax.f32 %v237_v45, 0.0  ;;  %v464_v54 = vunpack.c.l.bf16 %v550_v41  ;;  %v465_v55 = vunpack.c.h.bf16 %v550_v41 }
  0x1b   :  { %359 = vst [vmem:[%s1020_s3 + $0x88] sm:$0xff] %v295_v38  ;;  %v170_v56 = vmul.f32 %v597_v1, %v460_v49  ;;  %v171_v57 = vmul.f32 %v597_v1, %v461_v50  ;;  %v468_v58 = vunpack.c.l.bf16 %v551_v46  ;;  %v469_v59 = vunpack.c.h.bf16 %v551_v46  ;;  %v557_v46 = vld [vmem:[%s1017_s0 + $0xa0] sm:$0xff]  }
  0x1c   :  { %360 = vst [vmem:[%s1020_s3 + $0x90] sm:$0xff] %v296_v42  ;;  %v172_v60 = vmul.f32 %v597_v1, %v464_v54  ;;  %v173_v61 = vmul.f32 %v597_v1, %v465_v55  ;;  %v472_v62 = vunpack.c.l.bf16 %v552_v51  ;;  %v473_v63 = vunpack.c.h.bf16 %v552_v51  ;;  %v558_v51 = vld [vmem:[%s1017_s0 + $0xa8] sm:$0xff]  }
  0x1d   :  { %361 = vst [vmem:[%s1020_s3 + $0x98] sm:$0xff] %v297_v43  ;;  %v238_v0 = vadd.f32 %v602_v3, %v170_v56  ;;  %v239_v2 = vadd.f32 %v602_v3, %v171_v57  ;;  %v174_v4 = vmul.f32 %v597_v1, %v468_v58  ;;  %v175_v5 = vmul.f32 %v597_v1, %v469_v59  ;;  %v559_v56 = vld [vmem:[%s1017_s0 + $0xb0] sm:$0xff]  }
  0x1e   :  { %362 = vst [vmem:[%s1020_s3 + $0xa0] sm:$0xff] %v298_v47  ;;  %v240_v6 = vadd.f32 %v602_v3, %v172_v60  ;;  %v241_v7 = vadd.f32 %v602_v3, %v173_v61  ;;  %v176_v8 = vmul.f32 %v597_v1, %v472_v62  ;;  %v177_v9 = vmul.f32 %v597_v1, %v473_v63  ;;  %v560_v61 = vld [vmem:[%s1017_s0 + $0xb8] sm:$0xff]  }
  0x1f   :  { %363 = vst [vmem:[%s1020_s3 + $0xa8] sm:$0xff] %v299_v48  ;;  %v302_v11 = vmax.f32 %v238_v0, 0.0  ;;  %v303_v12 = vmax.f32 %v239_v2, 0.0  ;;  %v242_v13 = vadd.f32 %v602_v3, %v174_v4  ;;  %v243_v14 = vadd.f32 %v602_v3, %v175_v5 }
  0x20   :  { %364 = vst [vmem:[%s1020_s3 + $0xb0] sm:$0xff] %v300_v52  ;;  %v304_v16 = vmax.f32 %v240_v6, 0.0  ;;  %v305_v17 = vmax.f32 %v241_v7, 0.0  ;;  %v244_v18 = vadd.f32 %v602_v3, %v176_v8  ;;  %v245_v19 = vadd.f32 %v602_v3, %v177_v9 }
  0x21   :  { %365 = vst [vmem:[%s1020_s3 + $0xb8] sm:$0xff] %v301_v53  ;;  %v306_v21 = vmax.f32 %v242_v13, 0.0  ;;  %v307_v22 = vmax.f32 %v243_v14, 0.0  ;;  %v476_v23 = vunpack.c.l.bf16 %v553_v10  ;;  %v477_v24 = vunpack.c.h.bf16 %v553_v10 }
  0x22   :  { %366 = vst [vmem:[%s1020_s3 + $0xc0] sm:$0xff] %v302_v11  ;;  %v308_v26 = vmax.f32 %v244_v18, 0.0  ;;  %v309_v27 = vmax.f32 %v245_v19, 0.0  ;;  %v480_v28 = vunpack.c.l.bf16 %v554_v15  ;;  %v481_v29 = vunpack.c.h.bf16 %v554_v15 }
  0x23   :  { %367 = vst [vmem:[%s1020_s3 + $0xc8] sm:$0xff] %v303_v12  ;;  %v178_v30 = vmul.f32 %v597_v1, %v476_v23  ;;  %v179_v31 = vmul.f32 %v597_v1, %v477_v24  ;;  %v484_v32 = vunpack.c.l.bf16 %v555_v20  ;;  %v485_v33 = vunpack.c.h.bf16 %v555_v20  ;;  %v561_v20 = vld [vmem:[%s1017_s0 + $0xc0] sm:$0xff]  }
  0x24   :  { %368 = vst [vmem:[%s1020_s3 + $0xd0] sm:$0xff] %v304_v16  ;;  %v180_v34 = vmul.f32 %v597_v1, %v480_v28  ;;  %v181_v35 = vmul.f32 %v597_v1, %v481_v29  ;;  %v488_v36 = vunpack.c.l.bf16 %v556_v25  ;;  %v489_v37 = vunpack.c.h.bf16 %v556_v25  ;;  %v562_v25 = vld [vmem:[%s1017_s0 + $0xc8] sm:$0xff]  }
  0x25   :  { %369 = vst [vmem:[%s1020_s3 + $0xd8] sm:$0xff] %v305_v17  ;;  %v246_v38 = vadd.f32 %v602_v3, %v178_v30  ;;  %v247_v39 = vadd.f32 %v602_v3, %v179_v31  ;;  %v182_v40 = vmul.f32 %v597_v1, %v484_v32  ;;  %v183_v41 = vmul.f32 %v597_v1, %v485_v33  ;;  %v563_v30 = vld [vmem:[%s1017_s0 + $0xd0] sm:$0xff]  }
  0x26   :  { %370 = vst [vmem:[%s1020_s3 + $0xe0] sm:$0xff] %v306_v21  ;;  %v248_v42 = vadd.f32 %v602_v3, %v180_v34  ;;  %v249_v43 = vadd.f32 %v602_v3, %v181_v35  ;;  %v184_v44 = vmul.f32 %v597_v1, %v488_v36  ;;  %v185_v45 = vmul.f32 %v597_v1, %v489_v37  ;;  %v564_v35 = vld [vmem:[%s1017_s0 + $0xd8] sm:$0xff]  }
  0x27   :  { %371 = vst [vmem:[%s1020_s3 + $0xe8] sm:$0xff] %v307_v22  ;;  %v310_v47 = vmax.f32 %v246_v38, 0.0  ;;  %v311_v48 = vmax.f32 %v247_v39, 0.0  ;;  %v250_v49 = vadd.f32 %v602_v3, %v182_v40  ;;  %v251_v50 = vadd.f32 %v602_v3, %v183_v41 }
  0x28   :  { %372 = vst [vmem:[%s1020_s3 + $0xf0] sm:$0xff] %v308_v26  ;;  %v312_v52 = vmax.f32 %v248_v42, 0.0  ;;  %v313_v53 = vmax.f32 %v249_v43, 0.0  ;;  %v252_v54 = vadd.f32 %v602_v3, %v184_v44  ;;  %v253_v55 = vadd.f32 %v602_v3, %v185_v45 }
  0x29   :  { %373 = vst [vmem:[%s1020_s3 + $0xf8] sm:$0xff] %v309_v27  ;;  %v314_v57 = vmax.f32 %v250_v49, 0.0  ;;  %v315_v58 = vmax.f32 %v251_v50, 0.0  ;;  %v492_v59 = vunpack.c.l.bf16 %v557_v46  ;;  %v493_v60 = vunpack.c.h.bf16 %v557_v46 }
  0x2a   :  { %374 = vst [vmem:[%s1020_s3 + $0x100] sm:$0xff] %v310_v47  ;;  %v316_v62 = vmax.f32 %v252_v54, 0.0  ;;  %v317_v63 = vmax.f32 %v253_v55, 0.0  ;;  %v496_v0 = vunpack.c.l.bf16 %v558_v51  ;;  %v497_v2 = vunpack.c.h.bf16 %v558_v51 }
  0x2b   :  { %375 = vst [vmem:[%s1020_s3 + $0x108] sm:$0xff] %v311_v48  ;;  %v186_v4 = vmul.f32 %v597_v1, %v492_v59  ;;  %v187_v5 = vmul.f32 %v597_v1, %v493_v60  ;;  %v500_v6 = vunpack.c.l.bf16 %v559_v56  ;;  %v501_v7 = vunpack.c.h.bf16 %v559_v56  ;;  %v565_v56 = vld [vmem:[%s1017_s0 + $0xe0] sm:$0xff]  }
  0x2c   :  { %376 = vst [vmem:[%s1020_s3 + $0x110] sm:$0xff] %v312_v52  ;;  %v188_v8 = vmul.f32 %v597_v1, %v496_v0  ;;  %v189_v9 = vmul.f32 %v597_v1, %v497_v2  ;;  %v504_v10 = vunpack.c.l.bf16 %v560_v61  ;;  %v505_v11 = vunpack.c.h.bf16 %v560_v61  ;;  %v566_v61 = vld [vmem:[%s1017_s0 + $0xe8] sm:$0xff]  }
  0x2d   :  { %377 = vst [vmem:[%s1020_s3 + $0x118] sm:$0xff] %v313_v53  ;;  %v254_v12 = vadd.f32 %v602_v3, %v186_v4  ;;  %v255_v13 = vadd.f32 %v602_v3, %v187_v5  ;;  %v190_v14 = vmul.f32 %v597_v1, %v500_v6  ;;  %v191_v15 = vmul.f32 %v597_v1, %v501_v7  ;;  %v567_v4 = vld [vmem:[%s1017_s0 + $0xf0] sm:$0xff]  }
  0x2e   :  { %378 = vst [vmem:[%s1020_s3 + $0x120] sm:$0xff] %v314_v57  ;;  %v256_v16 = vadd.f32 %v602_v3, %v188_v8  ;;  %v257_v17 = vadd.f32 %v602_v3, %v189_v9  ;;  %v192_v18 = vmul.f32 %v597_v1, %v504_v10  ;;  %v193_v19 = vmul.f32 %v597_v1, %v505_v11  ;;  %v568_v9 = vld [vmem:[%s1017_s0 + $0xf8] sm:$0xff]  }
  0x2f   :  { %379 = vst [vmem:[%s1020_s3 + $0x128] sm:$0xff] %v315_v58  ;;  %v318_v21 = vmax.f32 %v254_v12, 0.0  ;;  %v319_v22 = vmax.f32 %v255_v13, 0.0  ;;  %v258_v23 = vadd.f32 %v602_v3, %v190_v14  ;;  %v259_v24 = vadd.f32 %v602_v3, %v191_v15 }
  0x30   :  { %380 = vst [vmem:[%s1020_s3 + $0x130] sm:$0xff] %v316_v62  ;;  %v320_v26 = vmax.f32 %v256_v16, 0.0  ;;  %v321_v27 = vmax.f32 %v257_v17, 0.0  ;;  %v260_v28 = vadd.f32 %v602_v3, %v192_v18  ;;  %v261_v29 = vadd.f32 %v602_v3, %v193_v19 }
  0x31   :  { %381 = vst [vmem:[%s1020_s3 + $0x138] sm:$0xff] %v317_v63  ;;  %v322_v31 = vmax.f32 %v258_v23, 0.0  ;;  %v323_v32 = vmax.f32 %v259_v24, 0.0  ;;  %v508_v33 = vunpack.c.l.bf16 %v561_v20  ;;  %v509_v34 = vunpack.c.h.bf16 %v561_v20 }
  0x32   :  { %382 = vst [vmem:[%s1020_s3 + $0x140] sm:$0xff] %v318_v21  ;;  %v324_v36 = vmax.f32 %v260_v28, 0.0  ;;  %v325_v37 = vmax.f32 %v261_v29, 0.0  ;;  %v512_v38 = vunpack.c.l.bf16 %v562_v25  ;;  %v513_v39 = vunpack.c.h.bf16 %v562_v25 }
  0x33   :  { %383 = vst [vmem:[%s1020_s3 + $0x148] sm:$0xff] %v319_v22  ;;  %v194_v40 = vmul.f32 %v597_v1, %v508_v33  ;;  %v195_v41 = vmul.f32 %v597_v1, %v509_v34  ;;  %v516_v42 = vunpack.c.l.bf16 %v563_v30  ;;  %v517_v43 = vunpack.c.h.bf16 %v563_v30 }
  0x34   :  { %384 = vst [vmem:[%s1020_s3 + $0x150] sm:$0xff] %v320_v26  ;;  %v196_v44 = vmul.f32 %v597_v1, %v512_v38  ;;  %v197_v45 = vmul.f32 %v597_v1, %v513_v39  ;;  %v520_v46 = vunpack.c.l.bf16 %v564_v35  ;;  %v521_v47 = vunpack.c.h.bf16 %v564_v35 }
  0x35   :  { %385 = vst [vmem:[%s1020_s3 + $0x158] sm:$0xff] %v321_v27  ;;  %v262_v48 = vadd.f32 %v602_v3, %v194_v40  ;;  %v263_v49 = vadd.f32 %v602_v3, %v195_v41  ;;  %v198_v50 = vmul.f32 %v597_v1, %v516_v42  ;;  %v199_v51 = vmul.f32 %v597_v1, %v517_v43 }
  0x36   :  { %386 = vst [vmem:[%s1020_s3 + $0x160] sm:$0xff] %v322_v31  ;;  %v264_v52 = vadd.f32 %v602_v3, %v196_v44  ;;  %v265_v53 = vadd.f32 %v602_v3, %v197_v45  ;;  %v200_v54 = vmul.f32 %v597_v1, %v520_v46  ;;  %v201_v55 = vmul.f32 %v597_v1, %v521_v47 }
  0x37   :  { %387 = vst [vmem:[%s1020_s3 + $0x168] sm:$0xff] %v323_v32  ;;  %v326_v57 = vmax.f32 %v262_v48, 0.0  ;;  %v327_v58 = vmax.f32 %v263_v49, 0.0  ;;  %v266_v59 = vadd.f32 %v602_v3, %v198_v50  ;;  %v267_v60 = vadd.f32 %v602_v3, %v199_v51 }
  0x38   :  { %388 = vst [vmem:[%s1020_s3 + $0x170] sm:$0xff] %v324_v36  ;;  %v328_v62 = vmax.f32 %v264_v52, 0.0  ;;  %v329_v63 = vmax.f32 %v265_v53, 0.0  ;;  %v268_v0 = vadd.f32 %v602_v3, %v200_v54  ;;  %v269_v2 = vadd.f32 %v602_v3, %v201_v55 }
  0x39   :  { %389 = vst [vmem:[%s1020_s3 + $0x178] sm:$0xff] %v325_v37  ;;  %v330_v5 = vmax.f32 %v266_v59, 0.0  ;;  %v331_v6 = vmax.f32 %v267_v60, 0.0  ;;  %v524_v7 = vunpack.c.l.bf16 %v565_v56  ;;  %v525_v8 = vunpack.c.h.bf16 %v565_v56 }
  0x3a   :  { %390 = vst [vmem:[%s1020_s3 + $0x180] sm:$0xff] %v326_v57  ;;  %v332_v10 = vmax.f32 %v268_v0, 0.0  ;;  %v333_v11 = vmax.f32 %v269_v2, 0.0  ;;  %v528_v12 = vunpack.c.l.bf16 %v566_v61  ;;  %v529_v13 = vunpack.c.h.bf16 %v566_v61 }
  0x3b   :  { %391 = vst [vmem:[%s1020_s3 + $0x188] sm:$0xff] %v327_v58  ;;  %v202_v14 = vmul.f32 %v597_v1, %v524_v7  ;;  %v203_v15 = vmul.f32 %v597_v1, %v525_v8  ;;  %v532_v16 = vunpack.c.l.bf16 %v567_v4  ;;  %v533_v17 = vunpack.c.h.bf16 %v567_v4 }
  0x3c   :  { %392 = vst [vmem:[%s1020_s3 + $0x190] sm:$0xff] %v328_v62  ;;  %v204_v18 = vmul.f32 %v597_v1, %v528_v12  ;;  %v205_v19 = vmul.f32 %v597_v1, %v529_v13  ;;  %v536_v20 = vunpack.c.l.bf16 %v568_v9  ;;  %v537_v21 = vunpack.c.h.bf16 %v568_v9 }
  0x3d   :  { %393 = vst [vmem:[%s1020_s3 + $0x198] sm:$0xff] %v329_v63  ;;  %v270_v22 = vadd.f32 %v602_v3, %v202_v14  ;;  %v271_v23 = vadd.f32 %v602_v3, %v203_v15  ;;  %v206_v24 = vmul.f32 %v597_v1, %v532_v16  ;;  %v207_v25 = vmul.f32 %v597_v1, %v533_v17 }
  0x3e   :  { %394 = vst [vmem:[%s1020_s3 + $0x1a0] sm:$0xff] %v330_v5  ;;  %v272_v26 = vadd.f32 %v602_v3, %v204_v18  ;;  %v273_v27 = vadd.f32 %v602_v3, %v205_v19  ;;  %v208_v28 = vmul.f32 %v597_v1, %v536_v20  ;;  %v209_v29 = vmul.f32 %v597_v1, %v537_v21 }
  0x3f   :  { %395 = vst [vmem:[%s1020_s3 + $0x1a8] sm:$0xff] %v331_v6  ;;  %v334_v30 = vmax.f32 %v270_v22, 0.0  ;;  %v335_v31 = vmax.f32 %v271_v23, 0.0  ;;  %v274_v32 = vadd.f32 %v602_v3, %v206_v24  ;;  %v275_v33 = vadd.f32 %v602_v3, %v207_v25 }
  0x40   :  { %396 = vst [vmem:[%s1020_s3 + $0x1b0] sm:$0xff] %v332_v10  ;;  %v336_v34 = vmax.f32 %v272_v26, 0.0  ;;  %v337_v35 = vmax.f32 %v273_v27, 0.0  ;;  %v276_v36 = vadd.f32 %v602_v3, %v208_v28  ;;  %v277_v1 = vadd.f32 %v602_v3, %v209_v29 }
  0x41   :  { %397 = vst [vmem:[%s1020_s3 + $0x1b8] sm:$0xff] %v333_v11  ;;  %v338_v37 = vmax.f32 %v274_v32, 0.0  ;;  %v339_v38 = vmax.f32 %v275_v33, 0.0 }
  0x42   :  { %398 = vst [vmem:[%s1020_s3 + $0x1c0] sm:$0xff] %v334_v30  ;;  %v340_v39 = vmax.f32 %v276_v36, 0.0  ;;  %v341_v3 = vmax.f32 %v277_v1, 0.0 }
  0x43   :  { %399 = vst [vmem:[%s1020_s3 + $0x1c8] sm:$0xff] %v335_v31 }
  0x44   :  { %400 = vst [vmem:[%s1020_s3 + $0x1d0] sm:$0xff] %v336_v34 }
  0x45   :  { %401 = vst [vmem:[%s1020_s3 + $0x1d8] sm:$0xff] %v337_v35 }
  0x46   :  { %402 = vst [vmem:[%s1020_s3 + $0x1e0] sm:$0xff] %v338_v37 }
  0x47   :  { %403 = vst [vmem:[%s1020_s3 + $0x1e8] sm:$0xff] %v339_v38 }
  0x48   :  { %404 = vst [vmem:[%s1020_s3 + $0x1f0] sm:$0xff] %v340_v39 }
  0x49   :  { %405 = vst [vmem:[%s1020_s3 + $0x1f8] sm:$0xff] %v341_v3 }

// kernel: basic_conv.2
= control target key start
LH: loop header
LB: loop body
LE: loop exit
PB: predicated region body
PF: predicated region fallthrough
CT: control target
= control target key end

     0   :  { %s2175_s1 = inlined_call_operand.vmem [shape: bf16[128,128], index: 1, kind: input, shape index: {}]   ;;  %s2176_s0 = inlined_call_operand.vmem [shape: bf16[512,128], index: 0, kind: input, shape index: {}]   ;;  %s2177_s2 = inlined_call_operand.vmem [shape: bf16[512,128], index: 2, kind: output, shape index: {0}]   ;;  %s2178_s3 = inlined_call_operand.vmem [shape: f32[8,128], index: 3, kind: output, shape index: {1}]   ;;  %s2179_s4 = inlined_call_operand.vmem [shape: f32[8,128], index: 4, kind: output, shape index: {2}]  }
   0x1   :  { %v1424_v0 = vld [vmem:[%s2175_s1 + $0x38] sm:$0xff]  ;;  %v1423_v1 = vld [vmem:[%s2175_s1 + $0x30] sm:$0xff]  ;;  %v1422_v2 = vld [vmem:[%s2175_s1 + $0x28] sm:$0xff] }
   0x2   :  { %505 = vmatpush.bf16.msra.mxu0 %v1424_v0  ;;  %1616 = vmatpush.bf16.msra.mxu1 %v1424_v0  ;;  %v1421_v3 = vld [vmem:[%s2175_s1 + $0x20] sm:$0xff]  ;;  %v1420_v4 = vld [vmem:[%s2175_s1 + $0x18] sm:$0xff]  ;;  %v1419_v5 = vld [vmem:[%s2175_s1 + $0x10] sm:$0xff] }
   0x3   :  { %1617 = vmatpush.bf16.msra.mxu2 %v1424_v0  ;;  %1618 = vmatpush.bf16.msra.mxu3 %v1424_v0  ;;  %v1418_v6 = vld [vmem:[%s2175_s1 + $0x8] sm:$0xff]  ;;  %v1417_v7 = vld [vmem:[%s2175_s1] sm:$0xff]  ;;  %v1387_v13 = vld [vmem:[%s2176_s0 + $0x10] sm:$0xff] }
   0x4   :  { %v1385_v8 = vld [vmem:[%s2176_s0] sm:$0xff]  ;;  %v1386_v10 = vld [vmem:[%s2176_s0 + $0x8] sm:$0xff]  ;;  %v1395_v14 = vld [vmem:[%s2176_s0 + $0x50] sm:$0xff] }
   0x5   :  { %v1393_v9 = vld [vmem:[%s2176_s0 + $0x40] sm:$0xff]  ;;  %v1394_v11 = vld [vmem:[%s2176_s0 + $0x48] sm:$0xff]  ;;  %v1388_v16 = vld [vmem:[%s2176_s0 + $0x18] sm:$0xff] }
   0x6   :  { %506 = vmatpush.bf16.msra.mxu0 %v1423_v1  ;;  %1619 = vmatpush.bf16.msra.mxu1 %v1423_v1  ;;  %v1401_v12 = vld [vmem:[%s2176_s0 + $0x80] sm:$0xff]  ;;  %v1402_v15 = vld [vmem:[%s2176_s0 + $0x88] sm:$0xff]  ;;  %v1396_v17 = vld [vmem:[%s2176_s0 + $0x58] sm:$0xff] }
   0x7   :  { %1620 = vmatpush.bf16.msra.mxu2 %v1423_v1  ;;  %1621 = vmatpush.bf16.msra.mxu3 %v1423_v1  ;;  %v1403_v18 = vld [vmem:[%s2176_s0 + $0x90] sm:$0xff]  ;;  %v1409_v19 = vld [vmem:[%s2176_s0 + $0xc0] sm:$0xff]  ;;  %v1404_v22 = vld [vmem:[%s2176_s0 + $0x98] sm:$0xff] }
   0x8   :  { %v1389_v20 = vld [vmem:[%s2176_s0 + $0x20] sm:$0xff]  ;;  %v1410_v23 = vld [vmem:[%s2176_s0 + $0xc8] sm:$0xff]  ;;  %v1411_v27 = vld [vmem:[%s2176_s0 + $0xd0] sm:$0xff] }
   0x9   :  { %v1397_v21 = vld [vmem:[%s2176_s0 + $0x60] sm:$0xff]  ;;  %v1390_v24 = vld [vmem:[%s2176_s0 + $0x28] sm:$0xff]  ;;  %v1391_v28 = vld [vmem:[%s2176_s0 + $0x30] sm:$0xff] }
   0xa   :  { %507 = vmatpush.bf16.msra.mxu0 %v1422_v2  ;;  %1622 = vmatpush.bf16.msra.mxu1 %v1422_v2  ;;  %v1398_v25 = vld [vmem:[%s2176_s0 + $0x68] sm:$0xff]  ;;  %v1405_v26 = vld [vmem:[%s2176_s0 + $0xa0] sm:$0xff]  ;;  %v1399_v29 = vld [vmem:[%s2176_s0 + $0x70] sm:$0xff] }
   0xb   :  { %1623 = vmatpush.bf16.msra.mxu2 %v1422_v2  ;;  %1624 = vmatpush.bf16.msra.mxu3 %v1422_v2  ;;  %v1406_v30 = vld [vmem:[%s2176_s0 + $0xa8] sm:$0xff]  ;;  %v1412_v31 = vld [vmem:[%s2176_s0 + $0xd8] sm:$0xff]  ;;  %v1407_v34 = vld [vmem:[%s2176_s0 + $0xb0] sm:$0xff] }
   0xc   :  { %v1392_v32 = vld [vmem:[%s2176_s0 + $0x38] sm:$0xff]  ;;  %v1413_v35 = vld [vmem:[%s2176_s0 + $0xe0] sm:$0xff]  ;;  %v1414_v39 = vld [vmem:[%s2176_s0 + $0xe8] sm:$0xff] }
   0xd   :  { %v1400_v33 = vld [vmem:[%s2176_s0 + $0x78] sm:$0xff]  ;;  %v1415_v53 = vld [vmem:[%s2176_s0 + $0xf0] sm:$0xff] }
   0xe   :  { %508 = vmatpush.bf16.msra.mxu0 %v1421_v3  ;;  %1625 = vmatpush.bf16.msra.mxu1 %v1421_v3  ;;  %v1408_v38 = vld [vmem:[%s2176_s0 + $0xb8] sm:$0xff] }
   0xf   :  { %1626 = vmatpush.bf16.msra.mxu2 %v1421_v3  ;;  %1627 = vmatpush.bf16.msra.mxu3 %v1421_v3 }
  0x12   :  { %509 = vmatpush.bf16.msra.mxu0 %v1420_v4  ;;  %1628 = vmatpush.bf16.msra.mxu1 %v1420_v4 }
  0x13   :  { %1629 = vmatpush.bf16.msra.mxu2 %v1420_v4  ;;  %1630 = vmatpush.bf16.msra.mxu3 %v1420_v4 }
  0x16   :  { %510 = vmatpush.bf16.msra.mxu0 %v1419_v5  ;;  %1631 = vmatpush.bf16.msra.mxu1 %v1419_v5 }
  0x17   :  { %1632 = vmatpush.bf16.msra.mxu2 %v1419_v5  ;;  %1633 = vmatpush.bf16.msra.mxu3 %v1419_v5  ;;  %v1416_v5 = vld [vmem:[%s2176_s0 + $0xf8] sm:$0xff] }
  0x1a   :  { %511 = vmatpush.bf16.msra.mxu0 %v1418_v6  ;;  %1634 = vmatpush.bf16.msra.mxu1 %v1418_v6 }
  0x1b   :  { %1635 = vmatpush.bf16.msra.mxu2 %v1418_v6  ;;  %1636 = vmatpush.bf16.msra.mxu3 %v1418_v6 }
  0x1e   :  { %512 = vmatpush.bf16.msra.mxu0 %v1417_v7  ;;  %1637 = vmatpush.bf16.msra.mxu1 %v1417_v7 }
  0x1f   :  { %1638 = vmatpush.bf16.msra.mxu2 %v1417_v7  ;;  %1639 = vmatpush.bf16.msra.mxu3 %v1417_v7 }
  0x21   :  { %513 = vmatmul.bf16.vlgmr.msra.gmra.mxu0 %v1385_v8  ;;  %553 = vmatmul.bf16.vlgmr.msra.gmra.mxu1 %v1393_v9 }
  0x22   :  { %593 = vmatmul.bf16.vlgmr.msra.gmra.mxu2 %v1401_v12  ;;  %633 = vmatmul.bf16.vlgmr.msra.gmra.mxu3 %v1409_v19 }
  0x31   :  { %518 = vmatmul.bf16.gmra.mxu0 %v1386_v10  ;;  %558 = vmatmul.bf16.gmra.mxu1 %v1394_v11 }
  0x32   :  { %598 = vmatmul.bf16.gmra.mxu2 %v1402_v15  ;;  %638 = vmatmul.bf16.gmra.mxu3 %v1410_v23 }
  0x41   :  { %523 = vmatmul.bf16.gmra.mxu0 %v1387_v13  ;;  %563 = vmatmul.bf16.gmra.mxu1 %v1395_v14 }
  0x42   :  { %603 = vmatmul.bf16.gmra.mxu2 %v1403_v18  ;;  %643 = vmatmul.bf16.gmra.mxu3 %v1411_v27 }
  0x51   :  { %528 = vmatmul.bf16.gmra.mxu0 %v1388_v16  ;;  %568 = vmatmul.bf16.gmra.mxu1 %v1396_v17 }
  0x52   :  { %608 = vmatmul.bf16.gmra.mxu2 %v1404_v22  ;;  %648 = vmatmul.bf16.gmra.mxu3 %v1412_v31 }
  0x61   :  { %533 = vmatmul.bf16.gmra.mxu0 %v1389_v20  ;;  %573 = vmatmul.bf16.gmra.mxu1 %v1397_v21 }
  0x62   :  { %613 = vmatmul.bf16.gmra.mxu2 %v1405_v26  ;;  %653 = vmatmul.bf16.gmra.mxu3 %v1413_v35 }
  0x71   :  { %538 = vmatmul.bf16.gmra.mxu0 %v1390_v24  ;;  %578 = vmatmul.bf16.gmra.mxu1 %v1398_v25 }
  0x72   :  { %618 = vmatmul.bf16.gmra.mxu2 %v1406_v30  ;;  %658 = vmatmul.bf16.gmra.mxu3 %v1414_v39 }
  0x81   :  { %543 = vmatmul.bf16.gmra.mxu0 %v1391_v28  ;;  %583 = vmatmul.bf16.gmra.mxu1 %v1399_v29 }
  0x82   :  { %623 = vmatmul.bf16.gmra.mxu2 %v1407_v34  ;;  %663 = vmatmul.bf16.gmra.mxu3 %v1415_v53 }
  0x91   :  { %548 = vmatmul.bf16.gmra.mxu0 %v1392_v32  ;;  %588 = vmatmul.bf16.gmra.mxu1 %v1400_v33 }
  0x92   :  { %628 = vmatmul.bf16.gmra.mxu2 %v1408_v38  ;;  %668 = vmatmul.bf16.gmra.mxu3 %v1416_v5 }
  0x9e   :  { %v514_v36 = vpop.f32.mrf.mxu0  ;;  %v1773_v37 = vpop.f32.mrf.mxu1 }
  0x9f   :  { %v1066_v40 = vmul.f32 %v514_v36, %v514_v36 }
  0xa5   :  { %v1800_v60 = vpop.f32.mrf.mxu2  ;;  %v1851_v20 = vpop.f32.mrf.mxu3 }
  0xa6   :  { %v516_v41 = vpop.f32.mrf.mxu0  ;;  %v1781_v42 = vpop.f32.mrf.mxu1 }
  0xa7   :  { %v1428_v43 = vpack.c.bf16 %v516_v41, %v514_v36  ;;  %v997_v44 = vadd.f32 %v516_v41, %v514_v36  ;;  %v1067_v45 = vmul.f32 %v516_v41, %v516_v41  ;;  %v1468_v46 = vpack.c.bf16 %v1781_v42, %v1773_v37 }
  0xa9   :  { %1429 = vst [vmem:[%s2177_s2] sm:$0xff] %v1428_v43   ;;  %v1130_v47 = vadd.f32 %v1067_v45, %v1066_v40 }
  0xaa   :  { %1592 = vst [vmem:[%s2177_s2 + $0x40] sm:$0xff] %v1468_v46  }
  0xad   :  { %v1812_v2 = vpop.f32.mrf.mxu2  ;;  %v1863_v24 = vpop.f32.mrf.mxu3 }
  0xae   :  { %v519_v48 = vpop.f32.mrf.mxu0  ;;  %v1791_v49 = vpop.f32.mrf.mxu1  ;;  %v1508_v3 = vpack.c.bf16 %v1812_v2, %v1800_v60  ;;  %v1548_v26 = vpack.c.bf16 %v1863_v24, %v1851_v20 }
  0xaf   :  { %v998_v50 = vadd.f32 %v997_v44, %v519_v48  ;;  %v1068_v51 = vmul.f32 %v519_v48, %v519_v48 }
  0xb0   :  { %1600 = vst [vmem:[%s2177_s2 + $0x80] sm:$0xff] %v1508_v3  }
  0xb1   :  { %v1131_v52 = vadd.f32 %v1130_v47, %v1068_v51  ;;  %1608 = vst [vmem:[%s2177_s2 + $0xc0] sm:$0xff] %v1548_v26  }
  0xb5   :  { %v1828_v10 = vpop.f32.mrf.mxu2  ;;  %v1881_v32 = vpop.f32.mrf.mxu3 }
  0xb6   :  { %v521_v54 = vpop.f32.mrf.mxu0  ;;  %v1796_v55 = vpop.f32.mrf.mxu1 }
  0xb7   :  { %v1433_v56 = vpack.c.bf16 %v521_v54, %v519_v48  ;;  %v999_v57 = vadd.f32 %v998_v50, %v521_v54  ;;  %v1069_v58 = vmul.f32 %v521_v54, %v521_v54  ;;  %v1473_v59 = vpack.c.bf16 %v1796_v55, %v1791_v49 }
  0xb9   :  { %1585 = vst [vmem:[%s2177_s2 + $0x8] sm:$0xff] %v1433_v56   ;;  %v1132_v61 = vadd.f32 %v1131_v52, %v1069_v58 }
  0xba   :  { %1593 = vst [vmem:[%s2177_s2 + $0x48] sm:$0xff] %v1473_v59  }
  0xbd   :  { %v1838_v13 = vpop.f32.mrf.mxu2  ;;  %v1893_v36 = vpop.f32.mrf.mxu3 }
  0xbe   :  { %v524_v62 = vpop.f32.mrf.mxu0  ;;  %v1808_v63 = vpop.f32.mrf.mxu1  ;;  %v1513_v14 = vpack.c.bf16 %v1838_v13, %v1828_v10  ;;  %v1553_v39 = vpack.c.bf16 %v1893_v36, %v1881_v32 }
  0xbf   :  { %v1810_v0 = vadd.f32 %v999_v57, %v524_v62  ;;  %v1070_v1 = vmul.f32 %v524_v62, %v524_v62 }
  0xc0   :  { %1601 = vst [vmem:[%s2177_s2 + $0x88] sm:$0xff] %v1513_v14  }
  0xc1   :  { %v1816_v4 = vadd.f32 %v1132_v61, %v1070_v1  ;;  %1609 = vst [vmem:[%s2177_s2 + $0xc8] sm:$0xff] %v1553_v39  }
  0xc5   :  { %v1849_v19 = vpop.f32.mrf.mxu2  ;;  %v1911_v46 = vpop.f32.mrf.mxu3 }
  0xc6   :  { %v526_v6 = vpop.f32.mrf.mxu0  ;;  %v1824_v7 = vpop.f32.mrf.mxu1 }
  0xc7   :  { %v1438_v8 = vpack.c.bf16 %v526_v6, %v524_v62  ;;  %v1478_v9 = vpack.c.bf16 %v1824_v7, %v1808_v63  ;;  %v1071_v52 = vmul.f32 %v526_v6, %v526_v6  ;;  %v1001_v57 = vadd.f32 %v1810_v0, %v526_v6 }
  0xc9   :  { %1586 = vst [vmem:[%s2177_s2 + $0x10] sm:$0xff] %v1438_v8   ;;  %v1134_v58 = vadd.f32 %v1816_v4, %v1071_v52 }
  0xca   :  { %1594 = vst [vmem:[%s2177_s2 + $0x50] sm:$0xff] %v1478_v9  }
  0xcd   :  { %v1861_v23 = vpop.f32.mrf.mxu2  ;;  %v1923_v51 = vpop.f32.mrf.mxu3 }
  0xce   :  { %v529_v11 = vpop.f32.mrf.mxu0  ;;  %v1836_v12 = vpop.f32.mrf.mxu1  ;;  %v1518_v25 = vpack.c.bf16 %v1861_v23, %v1849_v19  ;;  %v1558_v54 = vpack.c.bf16 %v1923_v51, %v1911_v46 }
  0xcf   :  { %v1072_v56 = vmul.f32 %v529_v11, %v529_v11  ;;  %v1002_v61 = vadd.f32 %v1001_v57, %v529_v11 }
  0xd0   :  { %1602 = vst [vmem:[%s2177_s2 + $0x90] sm:$0xff] %v1518_v25  }
  0xd1   :  { %1610 = vst [vmem:[%s2177_s2 + $0xd0] sm:$0xff] %v1558_v54   ;;  %v1135_v62 = vadd.f32 %v1134_v58, %v1072_v56 }
  0xd5   :  { %v1879_v31 = vpop.f32.mrf.mxu2  ;;  %v1943_v0 = vpop.f32.mrf.mxu3 }
  0xd6   :  { %v531_v15 = vpop.f32.mrf.mxu0  ;;  %v1845_v16 = vpop.f32.mrf.mxu1 }
  0xd7   :  { %v1443_v17 = vpack.c.bf16 %v531_v15, %v529_v11  ;;  %v1483_v18 = vpack.c.bf16 %v1845_v16, %v1836_v12  ;;  %v1073_v59 = vmul.f32 %v531_v15, %v531_v15  ;;  %v1003_v8 = vadd.f32 %v1002_v61, %v531_v15 }
  0xd9   :  { %1587 = vst [vmem:[%s2177_s2 + $0x18] sm:$0xff] %v1443_v17   ;;  %v1136_v6 = vadd.f32 %v1135_v62, %v1073_v59 }
  0xda   :  { %1595 = vst [vmem:[%s2177_s2 + $0x58] sm:$0xff] %v1483_v18  }
  0xdd   :  { %v1891_v35 = vpop.f32.mrf.mxu2 }
  0xde   :  { %v534_v21 = vpop.f32.mrf.mxu0  ;;  %v1859_v22 = vpop.f32.mrf.mxu1  ;;  %v1523_v38 = vpack.c.bf16 %v1891_v35, %v1879_v31 }
  0xdf   :  { %v1074_v1 = vmul.f32 %v534_v21, %v534_v21  ;;  %v1004_v25 = vadd.f32 %v1003_v8, %v534_v21 }
  0xe0   :  { %1603 = vst [vmem:[%s2177_s2 + $0x98] sm:$0xff] %v1523_v38  }
  0xe1   :  { %v1137_v4 = vadd.f32 %v1136_v6, %v1074_v1 }
  0xe5   :  { %v1909_v45 = vpop.f32.mrf.mxu2 }
  0xe6   :  { %v536_v27 = vpop.f32.mrf.mxu0  ;;  %v1875_v28 = vpop.f32.mrf.mxu1 }
  0xe7   :  { %v1448_v29 = vpack.c.bf16 %v536_v27, %v534_v21  ;;  %v1488_v30 = vpack.c.bf16 %v1875_v28, %v1859_v22  ;;  %v1075_v18 = vmul.f32 %v536_v27, %v536_v27  ;;  %v1005_v15 = vadd.f32 %v1004_v25, %v536_v27 }
  0xe9   :  { %1588 = vst [vmem:[%s2177_s2 + $0x20] sm:$0xff] %v1448_v29   ;;  %v1138_v26 = vadd.f32 %v1137_v4, %v1075_v18 }
  0xea   :  { %1596 = vst [vmem:[%s2177_s2 + $0x60] sm:$0xff] %v1488_v30  }
  0xed   :  { %v1921_v50 = vpop.f32.mrf.mxu2 }
  0xee   :  { %v539_v33 = vpop.f32.mrf.mxu0  ;;  %v1889_v34 = vpop.f32.mrf.mxu1  ;;  %v1528_v53 = vpack.c.bf16 %v1921_v50, %v1909_v45 }
  0xef   :  { %v1076_v11 = vmul.f32 %v539_v33, %v539_v33  ;;  %v1006_v30 = vadd.f32 %v1005_v15, %v539_v33 }
  0xf0   :  { %1604 = vst [vmem:[%s2177_s2 + $0xa0] sm:$0xff] %v1528_v53   ;;  %v1955_v53 = vpop.f32.mrf.mxu3 }
  0xf1   :  { %v1139_v38 = vadd.f32 %v1138_v26, %v1076_v11  ;;  %v1563_v27 = vpack.c.bf16 %v1955_v53, %v1943_v0  ;;  %v1083_v26 = vmul.f32 %v1781_v42, %v1781_v42 }
  0xf3   :  { %1611 = vst [vmem:[%s2177_s2 + $0xd8] sm:$0xff] %v1563_v27  }
  0xf5   :  { %v1941_v17 = vpop.f32.mrf.mxu2 }
  0xf6   :  { %v541_v40 = vpop.f32.mrf.mxu0  ;;  %v1905_v41 = vpop.f32.mrf.mxu1 }
  0xf7   :  { %v1453_v43 = vpack.c.bf16 %v541_v40, %v539_v33  ;;  %v1493_v44 = vpack.c.bf16 %v1905_v41, %v1889_v34  ;;  %v1077_v29 = vmul.f32 %v541_v40, %v541_v40  ;;  %v1007_v21 = vadd.f32 %v1006_v30, %v541_v40 }
  0xf8   :  { %v1973_v4 = vpop.f32.mrf.mxu3 }
  0xf9   :  { %1589 = vst [vmem:[%s2177_s2 + $0x28] sm:$0xff] %v1453_v43   ;;  %v1140_v54 = vadd.f32 %v1139_v38, %v1077_v29  ;;  %v1084_v38 = vmul.f32 %v1791_v49, %v1791_v49 }
  0xfa   :  { %1597 = vst [vmem:[%s2177_s2 + $0x68] sm:$0xff] %v1493_v44  }
  0xfd   :  { %v1953_v52 = vpop.f32.mrf.mxu2 }
  0xfe   :  { %v544_v47 = vpop.f32.mrf.mxu0  ;;  %v1919_v48 = vpop.f32.mrf.mxu1  ;;  %v1533_v57 = vpack.c.bf16 %v1953_v52, %v1941_v17 }
  0xff   :  { %v1078_v39 = vmul.f32 %v544_v47, %v544_v47  ;;  %v1008_v58 = vadd.f32 %v1007_v21, %v544_v47 }
 0x100   :  { %1605 = vst [vmem:[%s2177_s2 + $0xa8] sm:$0xff] %v1533_v57   ;;  %v1995_v57 = vpop.f32.mrf.mxu3 }
 0x101   :  { %v1141_v33 = vadd.f32 %v1140_v54, %v1078_v39  ;;  %v1568_v27 = vpack.c.bf16 %v1995_v57, %v1973_v4 }
 0x103   :  { %1612 = vst [vmem:[%s2177_s2 + $0xe0] sm:$0xff] %v1568_v27  }
 0x105   :  { %v1971_v25 = vpop.f32.mrf.mxu2 }
 0x106   :  { %v546_v3 = vpop.f32.mrf.mxu0  ;;  %v1937_v5 = vpop.f32.mrf.mxu1 }
 0x107   :  { %v1458_v9 = vpack.c.bf16 %v546_v3, %v544_v47  ;;  %v1498_v14 = vpack.c.bf16 %v1937_v5, %v1919_v48  ;;  %v1079_v56 = vmul.f32 %v546_v3, %v546_v3  ;;  %v1009_v40 = vadd.f32 %v1008_v58, %v546_v3 }
 0x108   :  { %v1082_v3 = vmul.f32 %v1773_v37, %v1773_v37  ;;  %v1095_v27 = vmul.f32 %v1937_v5, %v1937_v5 }
 0x109   :  { %1590 = vst [vmem:[%s2177_s2 + $0x30] sm:$0xff] %v1458_v9   ;;  %v1142_v61 = vadd.f32 %v1141_v33, %v1079_v56 }
 0x10a   :  { %1598 = vst [vmem:[%s2177_s2 + $0x70] sm:$0xff] %v1498_v14  }
 0x10d   :  { %v1993_v56 = vpop.f32.mrf.mxu2 }
 0x10e   :  { %v549_v43 = vpop.f32.mrf.mxu0  ;;  %v1951_v44 = vpop.f32.mrf.mxu1 }
 0x10f   :  { %v1080_v59 = vmul.f32 %v549_v43, %v549_v43  ;;  %v1010_v62 = vadd.f32 %v1009_v40, %v549_v43 }
 0x111   :  { %v1143_v1 = vadd.f32 %v1142_v61, %v1080_v59  ;;  %v1088_v61 = vmul.f32 %v1836_v12, %v1836_v12 }
 0x116   :  { %v551_v8 = vpop.f32.mrf.mxu0  ;;  %v1967_v9 = vpop.f32.mrf.mxu1 }
 0x117   :  { %v1463_v14 = vpack.c.bf16 %v551_v8, %v549_v43  ;;  %v1011_v6 = vadd.f32 %v1010_v62, %v551_v8  ;;  %v1081_v47 = vmul.f32 %v551_v8, %v551_v8  ;;  %v1503_v18 = vpack.c.bf16 %v1967_v9, %v1951_v44 }
 0x119   :  { %1591 = vst [vmem:[%s2177_s2 + $0x38] sm:$0xff] %v1463_v14   ;;  %v1012_v11 = vadd.f32 %v1011_v6, %v1773_v37  ;;  %v1144_v15 = vadd.f32 %v1143_v1, %v1081_v47  ;;  %v1085_v37 = vmul.f32 %v1796_v55, %v1796_v55  ;;  %v1089_v1 = vmul.f32 %v1845_v16, %v1845_v16  ;;  %v2019_v6 = vpop.f32.mrf.mxu2 }
 0x11a   :  { %1599 = vst [vmem:[%s2177_s2 + $0x78] sm:$0xff] %v1503_v18   ;;  %v1090_v47 = vmul.f32 %v1859_v22, %v1859_v22 }
 0x11b   :  { %v1013_v29 = vadd.f32 %v1012_v11, %v1781_v42  ;;  %v1145_v30 = vadd.f32 %v1144_v15, %v1082_v3  ;;  %v1538_v42 = vpack.c.bf16 %v1993_v56, %v1971_v25  ;;  %v1091_v11 = vmul.f32 %v1875_v28, %v1875_v28 }
 0x11d   :  { %v1014_v39 = vadd.f32 %v1013_v29, %v1791_v49  ;;  %v1146_v43 = vadd.f32 %v1145_v30, %v1083_v26  ;;  %v1086_v49 = vmul.f32 %v1808_v63, %v1808_v63  ;;  %1606 = vst [vmem:[%s2177_s2 + $0xb0] sm:$0xff] %v1538_v42   ;;  %v1093_v30 = vmul.f32 %v1905_v41, %v1905_v41 }
 0x11f   :  { %v1015_v21 = vadd.f32 %v1014_v39, %v1796_v55  ;;  %v1147_v54 = vadd.f32 %v1146_v43, %v1084_v38  ;;  %v1087_v55 = vmul.f32 %v1824_v7, %v1824_v7 }
 0x121   :  { %v1016_v58 = vadd.f32 %v1015_v21, %v1808_v63  ;;  %v1148_v33 = vadd.f32 %v1147_v54, %v1085_v37 }
 0x123   :  { %v1017_v59 = vadd.f32 %v1016_v58, %v1824_v7  ;;  %v1149_v40 = vadd.f32 %v1148_v33, %v1086_v49  ;;  %v2021_v7 = vpop.f32.mrf.mxu3 }
 0x125   :  { %v1150_v62 = vadd.f32 %v1149_v40, %v1087_v55  ;;  %v1018_v63 = vadd.f32 %v1017_v59, %v1836_v12  ;;  %v1097_v59 = vmul.f32 %v1967_v9, %v1967_v9 }
 0x127   :  { %v1019_v8 = vadd.f32 %v1018_v63, %v1845_v16  ;;  %v1151_v14 = vadd.f32 %v1150_v62, %v1088_v61  ;;  %v1092_v16 = vmul.f32 %v1889_v34, %v1889_v34  ;;  %v1099_v63 = vmul.f32 %v1812_v2, %v1812_v2 }
 0x129   :  { %v1020_v18 = vadd.f32 %v1019_v8, %v1859_v22  ;;  %v1152_v3 = vadd.f32 %v1151_v14, %v1089_v1  ;;  %v2035_v22 = vpop.f32.mrf.mxu2  ;;  %v1100_v8 = vmul.f32 %v1828_v10, %v1828_v10 }
 0x12b   :  { %v1021_v12 = vadd.f32 %v1020_v18, %v1875_v28  ;;  %v1153_v15 = vadd.f32 %v1152_v3, %v1090_v47  ;;  %v2037_v43 = vpop.f32.mrf.mxu3  ;;  %v1543_v28 = vpack.c.bf16 %v2035_v22, %v2019_v6  ;;  %v1101_v47 = vmul.f32 %v1838_v13, %v1838_v13 }
 0x12c   :  { %v1573_v37 = vpack.c.bf16 %v2037_v43, %v2021_v7 }
 0x12d   :  { %v1022_v26 = vadd.f32 %v1021_v12, %v1889_v34  ;;  %v1154_v29 = vadd.f32 %v1153_v15, %v1091_v11  ;;  %v1094_v34 = vmul.f32 %v1919_v48, %v1919_v48  ;;  %1607 = vst [vmem:[%s2177_s2 + $0xb8] sm:$0xff] %v1543_v28  }
 0x12e   :  { %1613 = vst [vmem:[%s2177_s2 + $0xe8] sm:$0xff] %v1573_v37   ;;  %v1106_v37 = vmul.f32 %v1909_v45, %v1909_v45 }
 0x12f   :  { %v1023_v38 = vadd.f32 %v1022_v26, %v1905_v41  ;;  %v1155_v39 = vadd.f32 %v1154_v29, %v1092_v16  ;;  %v1104_v26 = vmul.f32 %v1879_v31, %v1879_v31 }
 0x131   :  { %v1024_v21 = vadd.f32 %v1023_v38, %v1919_v48  ;;  %v1156_v54 = vadd.f32 %v1155_v39, %v1093_v30  ;;  %v1096_v48 = vmul.f32 %v1951_v44, %v1951_v44 }
 0x133   :  { %v1157_v41 = vadd.f32 %v1156_v54, %v1094_v34  ;;  %v1025_v42 = vadd.f32 %v1024_v21, %v1937_v5  ;;  %v2061_v40 = vpop.f32.mrf.mxu3  ;;  %v1098_v5 = vmul.f32 %v1800_v60, %v1800_v60  ;;  %v1107_v34 = vmul.f32 %v1921_v50, %v1921_v50 }
 0x135   :  { %v1158_v49 = vadd.f32 %v1157_v41, %v1095_v27  ;;  %v1026_v58 = vadd.f32 %v1025_v42, %v1951_v44  ;;  %v1108_v41 = vmul.f32 %v1941_v17, %v1941_v17 }
 0x137   :  { %v1159_v33 = vadd.f32 %v1158_v49, %v1096_v48  ;;  %v1027_v55 = vadd.f32 %v1026_v58, %v1967_v9  ;;  %v1109_v49 = vmul.f32 %v1953_v52, %v1953_v52 }
 0x139   :  { %v1028_v61 = vadd.f32 %v1027_v55, %v1800_v60  ;;  %v1160_v62 = vadd.f32 %v1159_v33, %v1097_v59 }
 0x13b   :  { %v1029_v1 = vadd.f32 %v1028_v61, %v1812_v2  ;;  %v1161_v44 = vadd.f32 %v1160_v62, %v1098_v5  ;;  %v2075_v60 = vpop.f32.mrf.mxu3  ;;  %v1102_v2 = vmul.f32 %v1849_v19, %v1849_v19  ;;  %v1112_v62 = vmul.f32 %v2019_v6, %v2019_v6 }
 0x13c   :  { %v1578_v11 = vpack.c.bf16 %v2075_v60, %v2061_v40 }
 0x13d   :  { %v1030_v14 = vadd.f32 %v1029_v1, %v1828_v10  ;;  %v1162_v9 = vadd.f32 %v1161_v44, %v1099_v63  ;;  %v1103_v10 = vmul.f32 %v1861_v23, %v1861_v23  ;;  %v1114_v44 = vmul.f32 %v1851_v20, %v1851_v20 }
 0x13e   :  { %1614 = vst [vmem:[%s2177_s2 + $0xf0] sm:$0xff] %v1578_v11  }
 0x13f   :  { %v1031_v18 = vadd.f32 %v1030_v14, %v1838_v13  ;;  %v1163_v3 = vadd.f32 %v1162_v9, %v1100_v8 }
 0x141   :  { %v1032_v12 = vadd.f32 %v1031_v18, %v1849_v19  ;;  %v1164_v15 = vadd.f32 %v1163_v3, %v1101_v47  ;;  %v1105_v19 = vmul.f32 %v1891_v35, %v1891_v35 }
 0x143   :  { %v1033_v13 = vadd.f32 %v1032_v12, %v1861_v23  ;;  %v1165_v16 = vadd.f32 %v1164_v15, %v1102_v2  ;;  %v2094_v28 = vpop.f32.mrf.mxu3 }
 0x145   :  { %v1166_v29 = vadd.f32 %v1165_v16, %v1103_v10  ;;  %v1034_v30 = vadd.f32 %v1033_v13, %v1879_v31 }
 0x147   :  { %v1035_v38 = vadd.f32 %v1034_v30, %v1891_v35  ;;  %v1167_v39 = vadd.f32 %v1166_v29, %v1104_v26 }
 0x149   :  { %v1036_v23 = vadd.f32 %v1035_v38, %v1909_v45  ;;  %v1168_v21 = vadd.f32 %v1167_v39, %v1105_v19 }
 0x14b   :  { %v1037_v54 = vadd.f32 %v1036_v23, %v1921_v50  ;;  %v1169_v31 = vadd.f32 %v1168_v21, %v1106_v37  ;;  %v671_v45 = vpop.f32.mrf.mxu3  ;;  %v1110_v50 = vmul.f32 %v1971_v25, %v1971_v25 }
 0x14c   :  { %v1583_v48 = vpack.c.bf16 %v671_v45, %v2094_v28 }
 0x14d   :  { %v1038_v35 = vadd.f32 %v1037_v54, %v1941_v17  ;;  %v1170_v42 = vadd.f32 %v1169_v31, %v1107_v34  ;;  %v1125_v34 = vmul.f32 %v2037_v43, %v2037_v43 }
 0x14e   :  { %1615 = vst [vmem:[%s2177_s2 + $0xf8] sm:$0xff] %v1583_v48   ;;  %v1129_v48 = vmul.f32 %v671_v45, %v671_v45 }
 0x14f   :  { %v1039_v27 = vadd.f32 %v1038_v35, %v1953_v52  ;;  %v1171_v58 = vadd.f32 %v1170_v42, %v1108_v41  ;;  %v1111_v52 = vmul.f32 %v1993_v56, %v1993_v56  ;;  %v1126_v41 = vmul.f32 %v2061_v40, %v2061_v40 }
 0x150   :  { %v1127_v42 = vmul.f32 %v2075_v60, %v2075_v60 }
 0x151   :  { %v1172_v33 = vadd.f32 %v1171_v58, %v1109_v49  ;;  %v1040_v55 = vadd.f32 %v1039_v27, %v1971_v25  ;;  %v1113_v25 = vmul.f32 %v2035_v22, %v2035_v22  ;;  %v1128_v49 = vmul.f32 %v2094_v28, %v2094_v28 }
 0x153   :  { %v1173_v17 = vadd.f32 %v1172_v33, %v1110_v50  ;;  %v1041_v59 = vadd.f32 %v1040_v55, %v1993_v56  ;;  %v1115_v56 = vmul.f32 %v1863_v24, %v1863_v24 }
 0x155   :  { %v1174_v5 = vadd.f32 %v1173_v17, %v1111_v52  ;;  %v1042_v61 = vadd.f32 %v1041_v59, %v2019_v6  ;;  %v1116_v6 = vmul.f32 %v1881_v32, %v1881_v32 }
 0x157   :  { %v1175_v63 = vadd.f32 %v1174_v5, %v1112_v62  ;;  %v1043_v1 = vadd.f32 %v1042_v61, %v2035_v22  ;;  %v1117_v22 = vmul.f32 %v1893_v36, %v1893_v36 }
 0x159   :  { %v1044_v8 = vadd.f32 %v1043_v1, %v1851_v20  ;;  %v1176_v14 = vadd.f32 %v1175_v63, %v1113_v25  ;;  %v1118_v20 = vmul.f32 %v1911_v46, %v1911_v46 }
 0x15b   :  { %v1045_v9 = vadd.f32 %v1044_v8, %v1863_v24  ;;  %v1177_v47 = vadd.f32 %v1176_v14, %v1114_v44  ;;  %v1119_v24 = vmul.f32 %v1923_v51, %v1923_v51 }
 0x15d   :  { %v1046_v18 = vadd.f32 %v1045_v9, %v1881_v32  ;;  %v1178_v3 = vadd.f32 %v1177_v47, %v1115_v56  ;;  %v1120_v32 = vmul.f32 %v1943_v0, %v1943_v0 }
 0x15f   :  { %v1047_v11 = vadd.f32 %v1046_v18, %v1893_v36  ;;  %v1179_v2 = vadd.f32 %v1178_v3, %v1116_v6  ;;  %v1121_v36 = vmul.f32 %v1955_v53, %v1955_v53 }
 0x161   :  { %v1048_v12 = vadd.f32 %v1047_v11, %v1911_v46  ;;  %v1180_v15 = vadd.f32 %v1179_v2, %v1117_v22  ;;  %v1122_v46 = vmul.f32 %v1973_v4, %v1973_v4 }
 0x163   :  { %v1049_v10 = vadd.f32 %v1048_v12, %v1923_v51  ;;  %v1181_v13 = vadd.f32 %v1180_v15, %v1118_v20  ;;  %v1123_v51 = vmul.f32 %v1995_v57, %v1995_v57 }
 0x165   :  { %v1182_v16 = vadd.f32 %v1181_v13, %v1119_v24  ;;  %v1050_v26 = vadd.f32 %v1049_v10, %v1943_v0  ;;  %v1124_v0 = vmul.f32 %v2021_v7, %v2021_v7 }
 0x167   :  { %v1051_v29 = vadd.f32 %v1050_v26, %v1955_v53  ;;  %v1183_v30 = vadd.f32 %v1182_v16, %v1120_v32 }
 0x169   :  { %v1052_v19 = vadd.f32 %v1051_v29, %v1973_v4  ;;  %v1184_v38 = vadd.f32 %v1183_v30, %v1121_v36 }
 0x16b   :  { %v1053_v39 = vadd.f32 %v1052_v19, %v1995_v57  ;;  %v1185_v37 = vadd.f32 %v1184_v38, %v1122_v46 }
 0x16d   :  { %v1054_v23 = vadd.f32 %v1053_v39, %v2021_v7  ;;  %v1186_v21 = vadd.f32 %v1185_v37, %v1123_v51 }
 0x16f   :  { %v1055_v53 = vadd.f32 %v1054_v23, %v2037_v43  ;;  %v1187_v54 = vadd.f32 %v1186_v21, %v1124_v0 }
 0x171   :  { %v1188_v4 = vadd.f32 %v1187_v54, %v1125_v34  ;;  %v1056_v31 = vadd.f32 %v1055_v53, %v2061_v40 }
 0x173   :  { %v1189_v57 = vadd.f32 %v1188_v4, %v1126_v41  ;;  %v1057_v35 = vadd.f32 %v1056_v31, %v2075_v60 }
 0x175   :  { %v1190_v7 = vadd.f32 %v1189_v57, %v1127_v42  ;;  %v1058_v27 = vadd.f32 %v1057_v35, %v2094_v28 }
 0x177   :  { %v1191_v43 = vadd.f32 %v1190_v7, %v1128_v49  ;;  %v1059_v58 = vadd.f32 %v1058_v27, %v671_v45 }
 0x179   :  { %v1060_v33 = vrot.slane %v1059_v58, 4  ;;  %v1192_v55 = vadd.f32 %v1191_v43, %v1129_v48 }
 0x17b   :  { %v1061_v50 = vadd.f32 %v1060_v33, %v1059_v58  ;;  %v1193_v17 = vrot.slane %v1192_v55, 4 }
 0x17d   :  { %v1062_v40 = vrot.slane %v1061_v50, 2  ;;  %v1194_v59 = vadd.f32 %v1193_v17, %v1192_v55 }
 0x17f   :  { %v1063_v52 = vadd.f32 %v1062_v40, %v1061_v50  ;;  %v1195_v5 = vrot.slane %v1194_v59, 2 }
 0x181   :  { %v1064_v61 = vrot.slane %v1063_v52, 1  ;;  %v1196_v62 = vadd.f32 %v1195_v5, %v1194_v59 }
 0x183   :  { %v1065_v60 = vadd.f32 %v1064_v61, %v1063_v52  ;;  %v1197_v63 = vrot.slane %v1196_v62, 1 }
 0x185   :  { %v1198_v1 = vadd.f32 %v1197_v63, %v1196_v62  ;;  %1199 = vst [vmem:[%s2178_s3] sm:$0xff] %v1065_v60 }
 0x187   :  { %1200 = vst [vmem:[%s2179_s4] sm:$0xff] %v1198_v1 }

</bundles_post_ra>
